<compile_context>
chip_gen: v7x
topology: tpu7x:2x2x1
jax: 0.10.0
libtpu: 0.0.40
codegen_flags: <defaults>
</compile_context>

<pallas_src>
import functools

import jax
import jax.numpy as jnp
from jax.experimental import pallas as pl
from jax.experimental.pallas import tpu as pltpu

ALPHA_RELU = 0.15
BN_EPS = 1e-5
_LANE = 128
_SUBLANE = 8


def _round_up(v, m):
    return (v + m - 1) // m * m


def _cdiv(a, b):
    return (a + b - 1) // b


def _pad2d(a, rows, cols):
    r, c = a.shape
    if r == rows and c == cols:
        return a
    return jnp.pad(a, ((0, rows - r), (0, cols - c)))


def _vmem_cap_bytes():
    """Generation-aware usable-VMEM cap: 3/4 of physical (96 MiB on 128-MiB
    v5e/v6e, 48 MiB on 64-MiB v7x); falls back to 48 MiB if the query fails."""
    cap = 64 << 20
    try:
        info = pltpu.get_tpu_info()
        cap = int(getattr(info, "vmem_capacity_bytes", cap))
    except Exception:
        pass
    return int(min(cap * 3 // 4, 112 << 20))


def _compiler_params(semantics, resident_bytes, streamed_bytes):
    """VMEM limit: assume 2 pipeline buffers even for constant-index blocks."""
    est = int(2 * resident_bytes + 2 * streamed_bytes) + (4 << 20)
    vmem = int(min(max(est, 16 << 20), _vmem_cap_bytes()))
    return pltpu.CompilerParams(dimension_semantics=semantics,
                                vmem_limit_bytes=vmem)


# ---------------------------------------------------------------------------
# Kernels
# ---------------------------------------------------------------------------
def _matmul_stats_kernel(x_ref, w_ref, h_ref, sum_ref, sq_ref):
    """h = x @ [w1 | wi] (fused, bf16 MXU operands, f32 acc); accumulate the
    per-shard sum / sum-of-squares from the f32 result, then store h in the
    (possibly lower-precision) intermediate dtype."""
    i = pl.program_id(1)

    @pl.when(i == 0)
    def _init():
        sum_ref[...] = jnp.zeros_like(sum_ref)
        sq_ref[...] = jnp.zeros_like(sq_ref)

    h = jnp.dot(x_ref[...], w_ref[...], preferred_element_type=jnp.float32)
    h_ref[...] = h.astype(h_ref.dtype)
    # (1, F) reduction broadcast-added into all 8 sublane rows of the resident
    # stats block (full-vreg stores, no masked sub-row writes); the wrapper
    # reads one row per shard.
    sum_ref[...] += jnp.sum(h, axis=0, keepdims=True)
    sq_ref[...] += jnp.sum(h * h, axis=0, keepdims=True)


def _norm_act_matmul_stats_kernel(h1_ref, s_ref, t_ref, w_ref,
                                  h2_ref, sum_ref, sq_ref,
                                  *, tile_n, tiles_per_shard, n_valid,
                                  alpha, mask_rows, compute_dtype):
    """a = lrelu(h1*s + t) in f32 VPU math; h2 = a @ w2 on the MXU; accumulate
    layer-2 sum / sum-of-squares (padded batch rows masked to zero)."""
    shard = pl.program_id(0)
    i = pl.program_id(1)

    @pl.when(i == 0)
    def _init():
        sum_ref[...] = jnp.zeros_like(sum_ref)
        sq_ref[...] = jnp.zeros_like(sq_ref)

    a = h1_ref[...].astype(jnp.float32) * s_ref[...] + t_ref[...]
    a = jnp.where(a >= 0, a, alpha * a)                # LeakyReLU
    if mask_rows:
        tile0 = (shard * tiles_per_shard + i) * tile_n
        row = jax.lax.broadcasted_iota(jnp.int32, a.shape, 0) + tile0
        a = jnp.where(row < n_valid, a, 0.0)
    h2 = jnp.dot(a.astype(compute_dtype), w_ref[...],
                 preferred_element_type=jnp.float32)
    h2_ref[...] = h2.astype(h2_ref.dtype)
    sum_ref[...] += jnp.sum(h2, axis=0, keepdims=True)
    sq_ref[...] += jnp.sum(h2 * h2, axis=0, keepdims=True)


def _finalize_skip_kernel(h2_ref, s_ref, t_ref, x_ref, out_ref, *, alpha):
    """out = lrelu(h2*s2 + t2) + x   (in_features == out_features)."""
    y = h2_ref[...].astype(jnp.float32) * s_ref[...] + t_ref[...]
    y = jnp.where(y >= 0, y, alpha * y)
    out_ref[...] = (y + x_ref[...].astype(jnp.float32)).astype(out_ref.dtype)


def _finalize_proj_kernel(h2_ref, s_ref, t_ref, hi_ref, si_ref, ti_ref,
                          out_ref, *, alpha):
    """out = lrelu(h2*s2 + t2) + lrelu(hi*si + ti)  (projection identity)."""
    y = h2_ref[...].astype(jnp.float32) * s_ref[...] + t_ref[...]
    y = jnp.where(y >= 0, y, alpha * y)
    ident = hi_ref[...].astype(jnp.float32) * si_ref[...] + ti_ref[...]
    ident = jnp.where(ident >= 0, ident, alpha * ident)
    out_ref[...] = (y + ident).astype(out_ref.dtype)


def _fused_kernel(x_ref, wcat_ref, w2_ref, p_ref, out_ref, *,
                  n_valid, alpha, eps, out_p, has_proj, compute_dtype):
    """Whole block in one call: h_cat/h2 never leave VMEM, BN folded in-kernel.
    p_ref rows: 0=g1 1=be1 2=g2 3=be2 [4=gi 5=bei]."""
    f32 = jnp.float32
    inv_n = 1.0 / n_valid
    x = x_ref[...]
    n_pad = x.shape[0]

    h_cat = jnp.dot(x.astype(compute_dtype), wcat_ref[...],
                    preferred_element_type=f32)
    # Zero-padded batch rows give h == 0 (no bias applied) -> contribute 0.
    mean_cat = jnp.sum(h_cat, axis=0, keepdims=True) * inv_n
    msq_cat = jnp.sum(h_cat * h_cat, axis=0, keepdims=True) * inv_n
    var_cat = jnp.maximum(msq_cat - mean_cat * mean_cat, 0.0)

    def fold(mean, var, gamma, beta):
        scale = gamma * jax.lax.rsqrt(var + eps)
        return scale, beta - mean * scale

    s1, t1 = fold(mean_cat[:, :out_p], var_cat[:, :out_p],
                  p_ref[0:1, :], p_ref[1:2, :])
    a1 = h_cat[:, :out_p] * s1 + t1
    a1 = jnp.where(a1 >= 0, a1, alpha * a1)
    if n_pad != n_valid:
        row = jax.lax.broadcasted_iota(jnp.int32, a1.shape, 0)
        a1 = jnp.where(row < n_valid, a1, 0.0)

    h2 = jnp.dot(a1.astype(compute_dtype), w2_ref[...],
                 preferred_element_type=f32)
    mean2 = jnp.sum(h2, axis=0, keepdims=True) * inv_n
    msq2 = jnp.sum(h2 * h2, axis=0, keepdims=True) * inv_n
    var2 = jnp.maximum(msq2 - mean2 * mean2, 0.0)
    s2, t2 = fold(mean2, var2, p_ref[2:3, :], p_ref[3:4, :])
    y = h2 * s2 + t2
    y = jnp.where(y >= 0, y, alpha * y)

    if has_proj:
        si, ti = fold(mean_cat[:, out_p:], var_cat[:, out_p:],
                      p_ref[4:5, :], p_ref[5:6, :])
        ident = h_cat[:, out_p:] * si + ti
        ident = jnp.where(ident >= 0, ident, alpha * ident)
    else:
        ident = x.astype(f32)
    out_ref[...] = (y + ident).astype(out_ref.dtype)


# ---------------------------------------------------------------------------
# Wrapper
# ---------------------------------------------------------------------------
def linear_residual_block(x, params, *, tile_n=512, alpha=ALPHA_RELU,
                          eps=BN_EPS, compute_dtype=jnp.bfloat16,
                          fused=None, stat_shards=2):
    """Pallas forward of LinearResidualBlock.

    x: (N, in_features)
    params: dict with w1,b1,g1,be1,w2,b2,g2,be2 and (iff in!=out) wi,bi,gi,bei.
            Weights are (in, out); bias/gamma/beta are (1, out).
    Linear biases are accepted for API fidelity but not applied (exact no-op
    under training-mode BatchNorm). compute_dtype is the MXU operand /
    HBM-intermediate dtype (bf16 default); all stats and VPU math are f32.
    fused=None auto-selects the single-call VMEM-resident fast path.
    """
    n, in_f = x.shape
    out_f = params["w1"].shape[1]
    has_proj = "wi" in params

    in_p = _round_up(in_f, _LANE)
    out_p = _round_up(out_f, _LANE)
    out_cat_p = 2 * out_p if has_proj else out_p

    f32 = jnp.float32
    itemsize = jnp.dtype(compute_dtype).itemsize
    x_itemsize = jnp.dtype(x.dtype).itemsize
    cap = _vmem_cap_bytes()

    # ---- pad / pack parameters (lane-dense feature widths) ------------------
    w1 = _pad2d(params["w1"].astype(f32), in_p, out_p)
    if has_proj:
        wi = _pad2d(params["wi"].astype(f32), in_p, out_p)
        w_cat = jnp.concatenate([w1, wi], axis=1)        # fused x @ [w1 | wi]
    else:
        w_cat = w1
    w2 = _pad2d(params["w2"].astype(f32), out_p, out_p)

    g1 = _pad2d(params["g1"].astype(f32), 1, out_p)
    be1 = _pad2d(params["be1"].astype(f32), 1, out_p)
    g2 = _pad2d(params["g2"].astype(f32), 1, out_p)
    be2 = _pad2d(params["be2"].astype(f32), 1, out_p)
    if has_proj:
        gi = _pad2d(params["gi"].astype(f32), 1, out_p)
        bei = _pad2d(params["bei"].astype(f32), 1, out_p)

    w_cat_mm = w_cat.astype(compute_dtype)
    w2_mm = w2.astype(compute_dtype)

    # ---- fused single-call fast path ----------------------------------------
    n_pad_f = _round_up(n, _SUBLANE)
    fused_bytes = (n_pad_f * in_p * max(itemsize, x_itemsize)
                   + in_p * out_cat_p * itemsize
                   + out_p * out_p * itemsize
                   + n_pad_f * out_cat_p * 4          # h_cat (f32 value)
                   + 3 * n_pad_f * out_p * 4          # a1 / h2 / y temps
                   + n_pad_f * out_p * x_itemsize     # output
                   + 2 * _SUBLANE * out_p * 4)
    use_fused = fused if fused is not None else (2 * fused_bytes <= cap)

    if use_fused:
        x_pad = _pad2d(x, n_pad_f, in_p)
        prows = [g1, be1, g2, be2] + ([gi, bei] if has_proj else [])
        p_stack = _pad2d(jnp.concatenate(prows, axis=0), _SUBLANE, out_p)
        kern = functools.partial(
            _fused_kernel, n_valid=n, alpha=alpha, eps=eps, out_p=out_p,
            has_proj=has_proj, compute_dtype=compute_dtype)
        out_pad = pl.pallas_call(
            kern,
            grid=(1,),
            in_specs=[pl.BlockSpec((n_pad_f, in_p), lambda i: (0, 0)),
                      pl.BlockSpec((in_p, out_cat_p), lambda i: (0, 0)),
                      pl.BlockSpec((out_p, out_p), lambda i: (0, 0)),
                      pl.BlockSpec((_SUBLANE, out_p), lambda i: (0, 0))],
            out_specs=pl.BlockSpec((n_pad_f, out_p), lambda i: (0, 0)),
            out_shape=jax.ShapeDtypeStruct((n_pad_f, out_p), x.dtype),
            compiler_params=_compiler_params(("arbitrary",), fused_bytes, 0),
        )(x_pad, w_cat_mm, w2_mm, p_stack)
        return out_pad[:n, :out_f]

    # ---- three-pass batch-tiled path -----------------------------------------
    n_shards = max(1, int(stat_shards))
    tn = max(_SUBLANE,
             min(_round_up(tile_n, _SUBLANE),
                 _round_up(_cdiv(n, n_shards), _SUBLANE)))
    n_pad = _round_up(n, tn * n_shards)
    tiles_per_shard = n_pad // (tn * n_shards)
    grid12 = (n_shards, tiles_per_shard)
    mask_rows = n_pad != n
    store_dtype = compute_dtype
    s_bytes = jnp.dtype(store_dtype).itemsize
    stats_rows = n_shards * _SUBLANE

    x_pad = _pad2d(x, n_pad, in_p)
    x_mm = x_pad.astype(compute_dtype)

    # ---- pass 1: h_cat = x @ [w1 | wi]  + per-shard batch statistics --------
    resident1 = w_cat_mm.size * itemsize + 2 * _SUBLANE * out_cat_p * 4
    streamed1 = tn * in_p * itemsize + tn * out_cat_p * s_bytes
    hcat, sum_cat, sq_cat = pl.pallas_call(
        _matmul_stats_kernel,
        grid=grid12,
        in_specs=[pl.BlockSpec((tn, in_p),
                               lambda s, i: (s * tiles_per_shard + i, 0)),
                  pl.BlockSpec((in_p, out_cat_p), lambda s, i: (0, 0))],
        out_specs=[pl.BlockSpec((tn, out_cat_p),
                                lambda s, i: (s * tiles_per_shard + i, 0)),
                   pl.BlockSpec((_SUBLANE, out_cat_p), lambda s, i: (s, 0)),
                   pl.BlockSpec((_SUBLANE, out_cat_p), lambda s, i: (s, 0))],
        out_shape=[jax.ShapeDtypeStruct((n_pad, out_cat_p), store_dtype),
                   jax.ShapeDtypeStruct((stats_rows, out_cat_p), f32),
                   jax.ShapeDtypeStruct((stats_rows, out_cat_p), f32)],
        compiler_params=_compiler_params(("parallel", "arbitrary"),
                                         resident1, streamed1),
    )(x_mm, w_cat_mm)

    # Fold BN (training-mode batch stats) into per-feature scale/shift.
    # Every row inside a shard's 8-row stats block holds the same total, so
    # take one row per shard and reduce across shards here (tiny XLA op).
    # TODO(synk): single-pass E[h^2]-mean^2 can cancel for huge batches /
    #             magnitudes; switch to per-tile centered accumulation if so.
    def fold(sum_rows, sq_rows, gamma, beta):
        s = jnp.sum(sum_rows[::_SUBLANE], axis=0, keepdims=True)
        q = jnp.sum(sq_rows[::_SUBLANE], axis=0, keepdims=True)
        mean = s / n
        var = jnp.maximum(q / n - mean * mean, 0.0)
        scale = gamma * jax.lax.rsqrt(var + eps)
        return scale, beta - mean * scale

    s1, t1 = fold(sum_cat[:, :out_p], sq_cat[:, :out_p], g1, be1)
    if has_proj:
        si, ti = fold(sum_cat[:, out_p:], sq_cat[:, out_p:], gi, bei)

    # ---- pass 2: a1 = lrelu(h1*s1+t1); h2 = a1 @ w2  + batch statistics -----
    resident2 = (w2_mm.size * itemsize + 2 * out_p * 4
                 + 2 * _SUBLANE * out_p * 4)
    streamed2 = 2 * tn * out_p * s_bytes
    kern2 = functools.partial(
        _norm_act_matmul_stats_kernel, tile_n=tn,
        tiles_per_shard=tiles_per_shard, n_valid=n, alpha=alpha,
        mask_rows=mask_rows, compute_dtype=compute_dtype)
    h2, sum2, sq2 = pl.pallas_call(
        kern2,
        grid=grid12,
        in_specs=[pl.BlockSpec((tn, out_p),
                               lambda s, i: (s * tiles_per_shard + i, 0)),
                  pl.BlockSpec((1, out_p), lambda s, i: (0, 0)),
                  pl.BlockSpec((1, out_p), lambda s, i: (0, 0)),
                  pl.BlockSpec((out_p, out_p), lambda s, i: (0, 0))],
        out_specs=[pl.BlockSpec((tn, out_p),
                                lambda s, i: (s * tiles_per_shard + i, 0)),
                   pl.BlockSpec((_SUBLANE, out_p), lambda s, i: (s, 0)),
                   pl.BlockSpec((_SUBLANE, out_p), lambda s, i: (s, 0))],
        out_shape=[jax.ShapeDtypeStruct((n_pad, out_p), store_dtype),
                   jax.ShapeDtypeStruct((stats_rows, out_p), f32),
                   jax.ShapeDtypeStruct((stats_rows, out_p), f32)],
        compiler_params=_compiler_params(("parallel", "arbitrary"),
                                         resident2, streamed2),
    )(hcat, s1, t1, w2_mm)

    s2, t2 = fold(sum2, sq2, g2, be2)

    # ---- pass 3: normalize layer 2, add identity branch ---------------------
    grid3 = (n_pad // tn,)
    if has_proj:
        kern3 = functools.partial(_finalize_proj_kernel, alpha=alpha)
        in_specs3 = [pl.BlockSpec((tn, out_p), lambda i: (i, 0)),  # h2
                     pl.BlockSpec((1, out_p), lambda i: (0, 0)),
                     pl.BlockSpec((1, out_p), lambda i: (0, 0)),
                     pl.BlockSpec((tn, out_p), lambda i: (i, 1)),  # identity cols
                     pl.BlockSpec((1, out_p), lambda i: (0, 0)),
                     pl.BlockSpec((1, out_p), lambda i: (0, 0))]
        args3 = (h2, s2, t2, hcat, si, ti)
        streamed3 = tn * out_p * (2 * s_bytes + x_itemsize)
    else:
        kern3 = functools.partial(_finalize_skip_kernel, alpha=alpha)
        in_specs3 = [pl.BlockSpec((tn, out_p), lambda i: (i, 0)),
                     pl.BlockSpec((1, out_p), lambda i: (0, 0)),
                     pl.BlockSpec((1, out_p), lambda i: (0, 0)),
                     pl.BlockSpec((tn, out_p), lambda i: (i, 0))]
        args3 = (h2, s2, t2, x_pad)
        streamed3 = tn * out_p * (s_bytes + 2 * x_itemsize)

    out_pad = pl.pallas_call(
        kern3,
        grid=grid3,
        in_specs=in_specs3,
        out_specs=pl.BlockSpec((tn, out_p), lambda i: (i, 0)),
        out_shape=jax.ShapeDtypeStruct((n_pad, out_p), x.dtype),
        compiler_params=_compiler_params(("parallel",), 4 * out_p * 4,
                                         streamed3),
    )(*args3)

    return out_pad[:n, :out_f]


# ---------------------------------------------------------------------------
# Pure-JAX reference (same math, including the cancelled bias) for sanity.
# ---------------------------------------------------------------------------
def _reference(x, params):
    def layer(x, w, b, g, be):
        h = x @ w + b
        mean = jnp.mean(h, axis=0, keepdims=True)
        var = jnp.mean((h - mean) ** 2, axis=0, keepdims=True)
        hn = (h - mean) / jnp.sqrt(var + BN_EPS) * g + be
        return jnp.where(hn >= 0, hn, ALPHA_RELU * hn)

    if "wi" in params:
        ident = layer(x, params["wi"], params["bi"], params["gi"], params["bei"])
    else:
        ident = x
    h = layer(x, params["w1"], params["b1"], params["g1"], params["be1"])
    h = layer(h, params["w2"], params["b2"], params["g2"], params["be2"])
    return h + ident


def _init_params(key, in_f, out_f):
    ks = jax.random.split(key, 12)
    p = {
        "w1": jax.random.normal(ks[0], (in_f, out_f), jnp.float32) * 0.1,
        "b1": jax.random.normal(ks[1], (1, out_f), jnp.float32) * 0.1,
        "g1": 1.0 + jax.random.normal(ks[2], (1, out_f), jnp.float32) * 0.05,
        "be1": jax.random.normal(ks[3], (1, out_f), jnp.float32) * 0.05,
        "w2": jax.random.normal(ks[4], (out_f, out_f), jnp.float32) * 0.1,
        "b2": jax.random.normal(ks[5], (1, out_f), jnp.float32) * 0.1,
        "g2": 1.0 + jax.random.normal(ks[6], (1, out_f), jnp.float32) * 0.05,
        "be2": jax.random.normal(ks[7], (1, out_f), jnp.float32) * 0.05,
    }
    if in_f != out_f:
        p.update({
            "wi": jax.random.normal(ks[8], (in_f, out_f), jnp.float32) * 0.1,
            "bi": jax.random.normal(ks[9], (1, out_f), jnp.float32) * 0.1,
            "gi": 1.0 + jax.random.normal(ks[10], (1, out_f), jnp.float32) * 0.05,
            "bei": jax.random.normal(ks[11], (1, out_f), jnp.float32) * 0.05,
        })
    return p


if __name__ == "__main__":
    key = jax.random.PRNGKey(0)
    k_x1, k_p1, k_x2, k_p2 = jax.random.split(key, 4)

    def _check(out, ref, atol, rtol):
        assert out.shape == ref.shape
        assert jnp.allclose(out, ref, atol=atol, rtol=rtol), \
            float(jnp.max(jnp.abs(out - ref)))

    # Case 1: in != out (projection identity branch).
    N1, IN_F, OUT_F = 48, 32, 64
    x1 = jax.random.normal(k_x1, (N1, IN_F), jnp.float32)
    p1 = _init_params(k_p1, IN_F, OUT_F)
    ref1 = _reference(x1, p1)

    # Default (bf16 MXU, fused fast path).
    out1 = jax.block_until_ready(linear_residual_block(x1, p1))
    _check(out1, ref1, atol=7e-2, rtol=7e-2)
    # f32 fused path: tight tolerance against the reference.
    out1f = jax.block_until_ready(
        linear_residual_block(x1, p1, compute_dtype=jnp.float32))
    _check(out1f, ref1, atol=1e-4, rtol=1e-4)
    # Three-pass (tiled + 2-shard stats) path, f32: exercises masking of padded
    # batch rows and the cross-shard statistics reduction.
    out1m = jax.block_until_ready(
        linear_residual_block(x1, p1, tile_n=16, fused=False,
                              compute_dtype=jnp.float32))
    _check(out1m, ref1, atol=1e-4, rtol=1e-4)
    # Three-pass path with the default bf16 operands / bf16 intermediates.
    out1mb = jax.block_until_ready(
        linear_residual_block(x1, p1, tile_n=16, fused=False))
    _check(out1mb, ref1, atol=7e-2, rtol=7e-2)

    # Case 2: in == out (pure skip); batch not a multiple of tile * shards.
    N2, F = 10, 64
    x2 = jax.random.normal(k_x2, (N2, F), jnp.float32)
    p2 = _init_params(k_p2, F, F)
    ref2 = _reference(x2, p2)

    out2 = jax.block_until_ready(linear_residual_block(x2, p2))   # fused bf16
    _check(out2, ref2, atol=7e-2, rtol=7e-2)
    out2m = jax.block_until_ready(
        linear_residual_block(x2, p2, tile_n=8, fused=False,
                              compute_dtype=jnp.float32))
    _check(out2m, ref2, atol=1e-4, rtol=1e-4)

    print("KERNEL_OK")
</pallas_src>

<mosaic_0001>
module attributes {stable_mosaic.version = 11 : i64} {
  func.func @_fused_kernel(%arg0: i32, %arg1: memref<48x128xf32, #tpu.memory_space<vmem>>, %arg2: memref<128x256xbf16, #tpu.memory_space<vmem>>, %arg3: memref<128x128xbf16, #tpu.memory_space<vmem>>, %arg4: memref<8x128xf32, #tpu.memory_space<vmem>>, %arg5: memref<48x128xf32, #tpu.memory_space<vmem>>) attributes {dimension_semantics = [#tpu.dimension_semantics<arbitrary>], iteration_bounds = array<i64: 1>, scalar_prefetch = 0 : i64, scratch_operands = 0 : i64, tpu.core_type = #tpu.core_type<tc>, window_params = [{pipeline_mode = #tpu.pipeline_mode<synchronous>, transform_indices = @transform_0, window_bounds = array<i64: 48, 128>}, {pipeline_mode = #tpu.pipeline_mode<synchronous>, transform_indices = @transform_1, window_bounds = array<i64: 128, 256>}, {pipeline_mode = #tpu.pipeline_mode<synchronous>, transform_indices = @transform_2, window_bounds = array<i64: 128, 128>}, {pipeline_mode = #tpu.pipeline_mode<synchronous>, transform_indices = @transform_3, window_bounds = array<i64: 8, 128>}, {pipeline_mode = #tpu.pipeline_mode<synchronous>, transform_indices = @transform_4, window_bounds = array<i64: 48, 128>}]} {
    %c0 = arith.constant 0 : index
    %c0_0 = arith.constant 0 : index
    %0 = vector.load %arg1[%c0, %c0_0] : memref<48x128xf32, #tpu.memory_space<vmem>>, vector<48x128xf32>
    %1 = arith.truncf %0 : vector<48x128xf32> to vector<48x128xbf16>
    %c0_1 = arith.constant 0 : index
    %c0_2 = arith.constant 0 : index
    %2 = vector.load %arg2[%c0_1, %c0_2] : memref<128x256xbf16, #tpu.memory_space<vmem>>, vector<128x256xbf16>
    %cst = arith.constant dense<0.000000e+00> : vector<48x256xf32>
    %3 = tpu.matmul %1, %2, %cst {dimension_numbers = #tpu.dot_dimension_numbers<[1], [0], [0], [1], [0, 0, 1, 1], [], []>} : vector<48x128xbf16>, vector<128x256xbf16>, vector<48x256xf32> -> vector<48x256xf32>
    %cst_3 = arith.constant dense<0.000000e+00> : vector<256xf32>
    %4 = vector.multi_reduction <add>, %3, %cst_3 [0] : vector<48x256xf32> to vector<256xf32>
    %5 = vector.shape_cast %4 : vector<256xf32> to vector<1x256xf32>
    %cst_4 = arith.constant 0.020833334 : f32
    %6 = vector.broadcast %cst_4 : f32 to vector<1x256xf32>
    %7 = arith.mulf %5, %6 : vector<1x256xf32>
    %8 = arith.mulf %3, %3 : vector<48x256xf32>
    %cst_5 = arith.constant dense<0.000000e+00> : vector<256xf32>
    %9 = vector.multi_reduction <add>, %8, %cst_5 [0] : vector<48x256xf32> to vector<256xf32>
    %10 = vector.shape_cast %9 : vector<256xf32> to vector<1x256xf32>
    %cst_6 = arith.constant 0.020833334 : f32
    %11 = vector.broadcast %cst_6 : f32 to vector<1x256xf32>
    %12 = arith.mulf %10, %11 : vector<1x256xf32>
    %13 = arith.mulf %7, %7 : vector<1x256xf32>
    %14 = arith.subf %12, %13 : vector<1x256xf32>
    %cst_7 = arith.constant 0.000000e+00 : f32
    %15 = vector.broadcast %cst_7 : f32 to vector<1x256xf32>
    %16 = arith.maximumf %14, %15 : vector<1x256xf32>
    %17 = vector.extract_strided_slice %7 {offsets = [0, 0], sizes = [1, 128], strides = [1, 1]} : vector<1x256xf32> to vector<1x128xf32>
    %18 = vector.extract_strided_slice %16 {offsets = [0, 0], sizes = [1, 128], strides = [1, 1]} : vector<1x256xf32> to vector<1x128xf32>
    %c0_8 = arith.constant 0 : index
    %c0_9 = arith.constant 0 : index
    %19 = vector.load %arg4[%c0_8, %c0_9] : memref<8x128xf32, #tpu.memory_space<vmem>>, vector<1x128xf32>
    %c1 = arith.constant 1 : index
    %c0_10 = arith.constant 0 : index
    %20 = vector.load %arg4[%c1, %c0_10] : memref<8x128xf32, #tpu.memory_space<vmem>>, vector<1x128xf32>
    %cst_11 = arith.constant 9.99999974E-6 : f32
    %21 = vector.broadcast %cst_11 : f32 to vector<1x128xf32>
    %22 = arith.addf %18, %21 : vector<1x128xf32>
    %23 = math.rsqrt %22 : vector<1x128xf32>
    %24 = arith.mulf %19, %23 : vector<1x128xf32>
    %25 = arith.mulf %17, %24 : vector<1x128xf32>
    %26 = arith.subf %20, %25 : vector<1x128xf32>
    %27 = vector.extract_strided_slice %3 {offsets = [0, 0], sizes = [48, 128], strides = [1, 1]} : vector<48x256xf32> to vector<48x128xf32>
    %28 = vector.broadcast %24 : vector<1x128xf32> to vector<48x128xf32>
    %29 = arith.mulf %27, %28 : vector<48x128xf32>
    %30 = vector.broadcast %26 : vector<1x128xf32> to vector<48x128xf32>
    %31 = arith.addf %29, %30 : vector<48x128xf32>
    %cst_12 = arith.constant 0.000000e+00 : f32
    %32 = vector.broadcast %cst_12 : f32 to vector<48x128xf32>
    %33 = arith.cmpf oge, %31, %32 : vector<48x128xf32>
    %cst_13 = arith.constant 1.500000e-01 : f32
    %34 = vector.broadcast %cst_13 : f32 to vector<48x128xf32>
    %35 = arith.mulf %34, %31 : vector<48x128xf32>
    %36 = arith.select %33, %31, %35 : vector<48x128xi1>, vector<48x128xf32>
    %37 = arith.truncf %36 : vector<48x128xf32> to vector<48x128xbf16>
    %c0_14 = arith.constant 0 : index
    %c0_15 = arith.constant 0 : index
    %38 = vector.load %arg3[%c0_14, %c0_15] : memref<128x128xbf16, #tpu.memory_space<vmem>>, vector<128x128xbf16>
    %cst_16 = arith.constant dense<0.000000e+00> : vector<48x128xf32>
    %39 = tpu.matmul %37, %38, %cst_16 {dimension_numbers = #tpu.dot_dimension_numbers<[1], [0], [0], [1], [0, 0, 1, 1], [], []>} : vector<48x128xbf16>, vector<128x128xbf16>, vector<48x128xf32> -> vector<48x128xf32>
    %cst_17 = arith.constant dense<0.000000e+00> : vector<128xf32>
    %40 = vector.multi_reduction <add>, %39, %cst_17 [0] : vector<48x128xf32> to vector<128xf32>
    %41 = vector.shape_cast %40 : vector<128xf32> to vector<1x128xf32>
    %cst_18 = arith.constant 0.020833334 : f32
    %42 = vector.broadcast %cst_18 : f32 to vector<1x128xf32>
    %43 = arith.mulf %41, %42 : vector<1x128xf32>
    %44 = arith.mulf %39, %39 : vector<48x128xf32>
    %cst_19 = arith.constant dense<0.000000e+00> : vector<128xf32>
    %45 = vector.multi_reduction <add>, %44, %cst_19 [0] : vector<48x128xf32> to vector<128xf32>
    %46 = vector.shape_cast %45 : vector<128xf32> to vector<1x128xf32>
    %cst_20 = arith.constant 0.020833334 : f32
    %47 = vector.broadcast %cst_20 : f32 to vector<1x128xf32>
    %48 = arith.mulf %46, %47 : vector<1x128xf32>
    %49 = arith.mulf %43, %43 : vector<1x128xf32>
    %50 = arith.subf %48, %49 : vector<1x128xf32>
    %cst_21 = arith.constant 0.000000e+00 : f32
    %51 = vector.broadcast %cst_21 : f32 to vector<1x128xf32>
    %52 = arith.maximumf %50, %51 : vector<1x128xf32>
    %c2 = arith.constant 2 : index
    %c0_22 = arith.constant 0 : index
    %53 = vector.load %arg4[%c2, %c0_22] : memref<8x128xf32, #tpu.memory_space<vmem>>, vector<1x128xf32>
    %c3 = arith.constant 3 : index
    %c0_23 = arith.constant 0 : index
    %54 = vector.load %arg4[%c3, %c0_23] : memref<8x128xf32, #tpu.memory_space<vmem>>, vector<1x128xf32>
    %cst_24 = arith.constant 9.99999974E-6 : f32
    %55 = vector.broadcast %cst_24 : f32 to vector<1x128xf32>
    %56 = arith.addf %52, %55 : vector<1x128xf32>
    %57 = math.rsqrt %56 : vector<1x128xf32>
    %58 = arith.mulf %53, %57 : vector<1x128xf32>
    %59 = arith.mulf %43, %58 : vector<1x128xf32>
    %60 = arith.subf %54, %59 : vector<1x128xf32>
    %61 = vector.broadcast %58 : vector<1x128xf32> to vector<48x128xf32>
    %62 = arith.mulf %39, %61 : vector<48x128xf32>
    %63 = vector.broadcast %60 : vector<1x128xf32> to vector<48x128xf32>
    %64 = arith.addf %62, %63 : vector<48x128xf32>
    %cst_25 = arith.constant 0.000000e+00 : f32
    %65 = vector.broadcast %cst_25 : f32 to vector<48x128xf32>
    %66 = arith.cmpf oge, %64, %65 : vector<48x128xf32>
    %cst_26 = arith.constant 1.500000e-01 : f32
    %67 = vector.broadcast %cst_26 : f32 to vector<48x128xf32>
    %68 = arith.mulf %67, %64 : vector<48x128xf32>
    %69 = arith.select %66, %64, %68 : vector<48x128xi1>, vector<48x128xf32>
    %70 = vector.extract_strided_slice %7 {offsets = [0, 128], sizes = [1, 128], strides = [1, 1]} : vector<1x256xf32> to vector<1x128xf32>
    %71 = vector.extract_strided_slice %16 {offsets = [0, 128], sizes = [1, 128], strides = [1, 1]} : vector<1x256xf32> to vector<1x128xf32>
    %c4 = arith.constant 4 : index
    %c0_27 = arith.constant 0 : index
    %72 = vector.load %arg4[%c4, %c0_27] : memref<8x128xf32, #tpu.memory_space<vmem>>, vector<1x128xf32>
    %c5 = arith.constant 5 : index
    %c0_28 = arith.constant 0 : index
    %73 = vector.load %arg4[%c5, %c0_28] : memref<8x128xf32, #tpu.memory_space<vmem>>, vector<1x128xf32>
    %cst_29 = arith.constant 9.99999974E-6 : f32
    %74 = vector.broadcast %cst_29 : f32 to vector<1x128xf32>
    %75 = arith.addf %71, %74 : vector<1x128xf32>
    %76 = math.rsqrt %75 : vector<1x128xf32>
    %77 = arith.mulf %72, %76 : vector<1x128xf32>
    %78 = arith.mulf %70, %77 : vector<1x128xf32>
    %79 = arith.subf %73, %78 : vector<1x128xf32>
    %80 = vector.extract_strided_slice %3 {offsets = [0, 128], sizes = [48, 128], strides = [1, 1]} : vector<48x256xf32> to vector<48x128xf32>
    %81 = vector.broadcast %77 : vector<1x128xf32> to vector<48x128xf32>
    %82 = arith.mulf %80, %81 : vector<48x128xf32>
    %83 = vector.broadcast %79 : vector<1x128xf32> to vector<48x128xf32>
    %84 = arith.addf %82, %83 : vector<48x128xf32>
    %cst_30 = arith.constant 0.000000e+00 : f32
    %85 = vector.broadcast %cst_30 : f32 to vector<48x128xf32>
    %86 = arith.cmpf oge, %84, %85 : vector<48x128xf32>
    %cst_31 = arith.constant 1.500000e-01 : f32
    %87 = vector.broadcast %cst_31 : f32 to vector<48x128xf32>
    %88 = arith.mulf %87, %84 : vector<48x128xf32>
    %89 = arith.select %86, %84, %88 : vector<48x128xi1>, vector<48x128xf32>
    %90 = arith.addf %69, %89 : vector<48x128xf32>
    %c0_32 = arith.constant 0 : index
    %c0_33 = arith.constant 0 : index
    %91 = vector.load %arg5[%c0_32, %c0_33] : memref<48x128xf32, #tpu.memory_space<vmem>>, vector<48x128xf32>
    tpu.vector_store %arg5[%c0_32, %c0_33], %90 {strides = array<i32>} : memref<48x128xf32, #tpu.memory_space<vmem>>, vector<48x128xf32>,
    return
  }
  func.func @transform_0(%arg0: i32) -> (i32, i32) {
    %c0_i32 = arith.constant 0 : i32
    %c0_i32_0 = arith.constant 0 : i32
    %c0_i32_1 = arith.constant 0 : i32
    return %c0_i32, %c0_i32_0 : i32, i32
  }
  func.func @transform_1(%arg0: i32) -> (i32, i32) {
    %c0_i32 = arith.constant 0 : i32
    %c0_i32_0 = arith.constant 0 : i32
    %c0_i32_1 = arith.constant 0 : i32
    return %c0_i32, %c0_i32_0 : i32, i32
  }
  func.func @transform_2(%arg0: i32) -> (i32, i32) {
    %c0_i32 = arith.constant 0 : i32
    %c0_i32_0 = arith.constant 0 : i32
    %c0_i32_1 = arith.constant 0 : i32
    return %c0_i32, %c0_i32_0 : i32, i32
  }
  func.func @transform_3(%arg0: i32) -> (i32, i32) {
    %c0_i32 = arith.constant 0 : i32
    %c0_i32_0 = arith.constant 0 : i32
    %c0_i32_1 = arith.constant 0 : i32
    return %c0_i32, %c0_i32_0 : i32, i32
  }
  func.func @transform_4(%arg0: i32) -> (i32, i32) {
    %c0_i32 = arith.constant 0 : i32
    %c0_i32_0 = arith.constant 0 : i32
    %c0_i32_1 = arith.constant 0 : i32
    return %c0_i32, %c0_i32_0 : i32, i32
  }
}

</mosaic_0001>

<bundles_post_ra>
// kernel: tpu_custom_call.1
= control target key start
LH: loop header
LB: loop body
LE: loop exit
PB: predicated region body
PF: predicated region fallthrough
CT: control target
= control target key end

     0   :  { %9 = vsyncpa [#allocation3], 0  ;;  %s1073_s0 = inlined_call_operand.hbm [shape: f32[48,128], index: 0, kind: input, shape index: {}]   ;;  %s1074_s1 = inlined_call_operand.hbm [shape: bf16[128,256], index: 1, kind: input, shape index: {}]   ;;  %s1075_s2 = inlined_call_operand.hbm [shape: bf16[128,128], index: 2, kind: input, shape index: {}]   ;;  %s1076_s3 = inlined_call_operand.vmem [shape: f32[8,128], index: 3, kind: input, shape index: {}]   ;;  %s1077_s4 = inlined_call_operand.hbm [shape: f32[48,128], index: 4, kind: output, shape index: {}]  }
   0x1   :  { %10 = vsyncpa [#allocation6], 0 }
   0x2   :  { %11 = vsyncpa [#allocation4], 0  ;;  %s822_s15 = smov [#allocation5]   ;;  %s823_s17 = smov [#allocation2]  }
   0x3   :  { %s29_s16 = sshll.u32 %s822_s15, 4  ;;  %s17_s18 = sshll.u32 %s823_s17, 4  ;;  %s30_s16 = int_to_ptr.vmem [resolvable:$true] %s29_s16  ;;  %s858_s18 = int_to_ptr.vmem [resolvable:$true] %s17_s18 }
   0x4   :  { %s728_s21 = scalar_lea.hbm %s1074_s1, 2048 }
   0x5   :  { %p729_p0 = scmp.ne.s32.totalorder %s1074_s1, %s728_s21  ;;  %p732_p1 = scmp.lt.u32.totalorder %s728_s21, %s1074_s1 }
   0x7   :  { %p734_p2 = pnand %p732_p1, %p729_p0 }
   0x9   :  { %737 = shalt.err (!%p734_p2)
}
   0xa   :  { %s738_s26 = scalar_lea.vmem %s30_s16, 2048  ;;  %p743_p4 = scmp.lt.s32.totalorder %s30_s16, %s30_s16 }
   0xb   :  { %p739_p3 = scmp.ne.s32.totalorder %s30_s16, %s738_s26  ;;  %p744_p5 = scmp.lt.s32.totalorder %s738_s26, %s738_s26 }
   0xd   :  { %p745_p6 = por %p744_p5, %p743_p4 }
   0xf   :  { %p746_p7 = pnand %p745_p6, %p739_p3 }
  0x11   :  { %749 = shalt.err (!%p746_p7)
}
  0x12   :  { %s824_s27 = smov 128   ;;  %s825_s28 = smov 8  }
  0x13   :  { %35 = dma.hbm_to_vmem [thread:$0]  %s1074_s1, 2048, %s30_s16, [#allocation6], %s824_s27, %s824_s27, %s825_s28  }
  0x14   :  { %s750_s7 = scalar_lea.hbm %s1073_s0, 768 }
  0x15   :  { %p751_p8 = scmp.ne.s32.totalorder %s1073_s0, %s750_s7  ;;  %p754_p9 = scmp.lt.u32.totalorder %s750_s7, %s1073_s0 }
  0x17   :  { %p756_p10 = pnand %p754_p9, %p751_p8 }
  0x19   :  { %759 = shalt.err (!%p756_p10)
}
  0x1a   :  { %s760_s12 = scalar_lea.vmem %s858_s18, 768  ;;  %p765_p12 = scmp.lt.s32.totalorder %s858_s18, %s858_s18 }
  0x1b   :  { %p761_p11 = scmp.ne.s32.totalorder %s858_s18, %s760_s12  ;;  %p766_p13 = scmp.lt.s32.totalorder %s760_s12, %s760_s12 }
  0x1d   :  { %p767_p0 = por %p766_p13, %p765_p12 }
  0x1f   :  { %p768_p1 = pnand %p767_p0, %p761_p11 }
  0x21   :  { %771 = shalt.err (!%p768_p1)
}
  0x22   :  { %23 = dma.hbm_to_vmem [thread:$0]  %s1073_s0, 768, %s858_s18, [#allocation3], %s824_s27, %s824_s27, %s825_s28  }
  0x23   :  { %s826_s14 = smov [#allocation7]   ;;  %s772_s19 = scalar_lea.hbm %s1075_s2, 1024 }
  0x24   :  { %s41_s15 = sshll.u32 %s826_s14, 4  ;;  %p773_p2 = scmp.ne.s32.totalorder %s1075_s2, %s772_s19  ;;  %s42_s15 = int_to_ptr.vmem [resolvable:$true] %s41_s15 }
  0x25   :  { %p776_p3 = scmp.lt.u32.totalorder %s772_s19, %s1075_s2 }
  0x27   :  { %p778_p4 = pnand %p776_p3, %p773_p2 }
  0x29   :  { %781 = shalt.err (!%p778_p4)
}
  0x2a   :  { %s782_s24 = scalar_lea.vmem %s42_s15, 1024  ;;  %p787_p6 = scmp.lt.s32.totalorder %s42_s15, %s42_s15 }
  0x2b   :  { %p783_p5 = scmp.ne.s32.totalorder %s42_s15, %s782_s24  ;;  %p788_p7 = scmp.lt.s32.totalorder %s782_s24, %s782_s24 }
  0x2d   :  { %p789_p8 = por %p788_p7, %p787_p6 }
  0x2f   :  { %p790_p9 = pnand %p789_p8, %p783_p5 }
  0x31   :  { %793 = shalt.err (!%p790_p9)
}
  0x32   :  { %s827_s0 = smov 64   ;;  %s828_s18 = smov 4  }
  0x33   :  { %47 = dma.hbm_to_vmem [thread:$0]  %s1075_s2, 1024, %s42_s15, [#allocation6], %s827_s0, %s827_s0, %s828_s18  }
  0x34   :  { %816 = dma.done.wait [#allocation3], 768  }
  0x35   :  { %817 = vsyncadd [#allocation3], 4294966528 }
  0x36   :  { %818 = dma.done.wait [#allocation6], 3072  }
  0x37   :  { %819 = vsyncadd [#allocation6], 4294964224  ;;  %v829_v0 = vmov 0   ;;  %v690_v1 = vld [vmem:[#allocation5 + $0x4] ss:$8 sps:$4 sm:$0xff]   ;;  %v60_v17 = vld [vmem:[#allocation2] sm:$0xff] }
  0x38   :  { %197 = vmatprep.mubr.bf16.mxu0 %v829_v0  ;;  %v692_v2 = vld [vmem:[#allocation5] ss:$8 sps:$4 sm:$0xff]   ;;  %165 = vmatprep.subr.bf16.mxu0 %v690_v1  ;;  %v693_v3 = vld [vmem:[#allocation5 + $0x14] ss:$8 sps:$4 sm:$0xff]   ;;  %v695_v4 = vld [vmem:[#allocation5 + $0x10] ss:$8 sps:$4 sm:$0xff]  }
  0x39   :  { %166 = vmatpush1.bf16.msra.mxu0 %v692_v2  ;;  %v696_v5 = vld [vmem:[#allocation5 + $0x24] ss:$8 sps:$4 sm:$0xff]   ;;  %v698_v6 = vld [vmem:[#allocation5 + $0x20] ss:$8 sps:$4 sm:$0xff]   ;;  %v699_v7 = vld [vmem:[#allocation5 + $0x34] ss:$8 sps:$4 sm:$0xff]  }
  0x3a   :  { %167 = vmatprep.subr.bf16.mxu0 %v693_v3  ;;  %v701_v8 = vld [vmem:[#allocation5 + $0x30] ss:$8 sps:$4 sm:$0xff]   ;;  %v702_v9 = vld [vmem:[#allocation5 + $0x44] ss:$8 sps:$4 sm:$0xff]   ;;  %v704_v10 = vld [vmem:[#allocation5 + $0x40] ss:$8 sps:$4 sm:$0xff]  }
  0x3b   :  { %v705_v11 = vld [vmem:[#allocation5 + $0x54] ss:$8 sps:$4 sm:$0xff]   ;;  %v707_v12 = vld [vmem:[#allocation5 + $0x50] ss:$8 sps:$4 sm:$0xff]   ;;  %v708_v13 = vld [vmem:[#allocation5 + $0x64] ss:$8 sps:$4 sm:$0xff]  }
  0x3c   :  { %v710_v14 = vld [vmem:[#allocation5 + $0x60] ss:$8 sps:$4 sm:$0xff]   ;;  %v711_v15 = vld [vmem:[#allocation5 + $0x74] ss:$8 sps:$4 sm:$0xff]   ;;  %v713_v16 = vld [vmem:[#allocation5 + $0x70] ss:$8 sps:$4 sm:$0xff]  }
  0x3d   :  { %168 = vmatpush1.bf16.msra.mxu0 %v695_v4  ;;  %v61_v18 = vld [vmem:[#allocation2 + $0x8] sm:$0xff]  ;;  %v62_v20 = vld [vmem:[#allocation2 + $0x10] sm:$0xff]  ;;  %v63_v21 = vld [vmem:[#allocation2 + $0x18] sm:$0xff]  ;;  %v830_v27 = vmov 0.0   ;;  %vm831_vm0 = vmmov 0  }
  0x3e   :  { %169 = vmatprep.subr.bf16.mxu0 %v696_v5  ;;  %v66_v19 = vpack.c.bf16 %v61_v18, %v60_v17  ;;  %v67_v22 = vpack.c.bf16 %v63_v21, %v62_v20  ;;  %v64_v23 = vld [vmem:[#allocation2 + $0x20] sm:$0xff]  ;;  %v65_v24 = vld [vmem:[#allocation2 + $0x28] sm:$0xff]  ;;  %v714_v26 = vld [vmem:[#allocation7] sm:$0xff]   ;;  %651 = vmatprep.subr.bf16.mxu1 %v830_v27 }
  0x3f   :  { %v68_v25 = vpack.c.bf16 %v65_v24, %v64_v23  ;;  %652 = vmatpush3.bf16.msra.mxu1 %v714_v26  ;;  %v715_v28 = vld [vmem:[#allocation7 + $0x8] sm:$0xff]   ;;  %v716_v29 = vld [vmem:[#allocation7 + $0x10] sm:$0xff]   ;;  %v717_v30 = vld [vmem:[#allocation7 + $0x18] sm:$0xff]   ;;  %667 = vmatprep.mubr.msk.bf16.mxu1 %vm831_vm0, %v830_v27 }
  0x40   :  { %653 = vmatprep.subr.bf16.mxu1 %v830_v27  ;;  %v718_v31 = vld [vmem:[#allocation7 + $0x20] sm:$0xff]   ;;  %v719_v32 = vld [vmem:[#allocation7 + $0x28] sm:$0xff]   ;;  %v720_v33 = vld [vmem:[#allocation7 + $0x30] sm:$0xff]  }
  0x41   :  { %170 = vmatpush1.bf16.msra.mxu0 %v698_v6  ;;  %v721_v34 = vld [vmem:[#allocation7 + $0x38] sm:$0xff]  }
  0x42   :  { %171 = vmatprep.subr.bf16.mxu0 %v699_v7 }
  0x43   :  { %654 = vmatpush3.bf16.msra.mxu1 %v715_v28 }
  0x44   :  { %655 = vmatprep.subr.bf16.mxu1 %v830_v27 }
  0x45   :  { %172 = vmatpush1.bf16.msra.mxu0 %v701_v8 }
  0x46   :  { %173 = vmatprep.subr.bf16.mxu0 %v702_v9 }
  0x47   :  { %656 = vmatpush3.bf16.msra.mxu1 %v716_v29 }
  0x48   :  { %657 = vmatprep.subr.bf16.mxu1 %v830_v27 }
  0x49   :  { %174 = vmatpush1.bf16.msra.mxu0 %v704_v10 }
  0x4a   :  { %175 = vmatprep.subr.bf16.mxu0 %v705_v11 }
  0x4b   :  { %658 = vmatpush3.bf16.msra.mxu1 %v717_v30 }
  0x4c   :  { %659 = vmatprep.subr.bf16.mxu1 %v830_v27 }
  0x4d   :  { %176 = vmatpush1.bf16.msra.mxu0 %v707_v12 }
  0x4e   :  { %177 = vmatprep.subr.bf16.mxu0 %v708_v13 }
  0x4f   :  { %660 = vmatpush3.bf16.msra.mxu1 %v718_v31 }
  0x50   :  { %661 = vmatprep.subr.bf16.mxu1 %v830_v27 }
  0x51   :  { %178 = vmatpush1.bf16.msra.mxu0 %v710_v14 }
  0x52   :  { %179 = vmatprep.subr.bf16.mxu0 %v711_v15 }
  0x53   :  { %662 = vmatpush3.bf16.msra.mxu1 %v719_v32 }
  0x54   :  { %663 = vmatprep.subr.bf16.mxu1 %v830_v27 }
  0x55   :  { %180 = vmatpush1.bf16.msra.mxu0 %v713_v16 }
  0x57   :  { %664 = vmatpush3.bf16.msra.mxu1 %v720_v33 }
  0x58   :  { %198 = vmatmul.mubr.bf16.vlgmr.msra.gmra.mrb[0].mxu0 %v66_v19  ;;  %665 = vmatprep.subr.bf16.mxu1 %v830_v27 }
  0x59   :  { %207 = vmatprep.mubr.bf16.mxu0 %v829_v0 }
  0x5b   :  { %666 = vmatpush3.bf16.msra.mxu1 %v721_v34 }
  0x60   :  { %208 = vmatmul.mubr.bf16.gmra.mrb[4].mxu0 %v67_v22 }
  0x61   :  { %217 = vmatprep.mubr.bf16.mxu0 %v829_v0 }
  0x68   :  { %218 = vmatmul.mubr.bf16.gmra.mrb[8].mxu0 %v68_v25 }
 0x12b   :  { %v917_v35 = vpop.f32.mrb[0].mxu0 }
 0x12c   :  { %v919_v36 = vpop.f32.mrb[1].mxu0  ;;  %v252_v38 = vmul.f32 %v917_v35, %v917_v35 }
 0x12d   :  { %v921_v37 = vpop.f32.mrb[2].mxu0  ;;  %v253_v42 = vmul.f32 %v919_v36, %v919_v36 }
 0x12e   :  { %v228_v39 = vadd.f32 %v921_v37, %v917_v35  ;;  %v254_v40 = vmul.f32 %v921_v37, %v921_v37  ;;  %v929_v41 = vpop.f32.mrb[3].mxu0 }
 0x12f   :  { %v239_v43 = vadd.f32 %v929_v41, %v919_v36  ;;  %v255_v44 = vmul.f32 %v929_v41, %v929_v41 }
 0x130   :  { %v264_v45 = vadd.f32 %v254_v40, %v252_v38 }
 0x131   :  { %v275_v46 = vadd.f32 %v255_v44, %v253_v42 }
 0x133   :  { %v937_v47 = vpop.f32.mrb[4].mxu0 }
 0x134   :  { %v229_v48 = vadd.f32 %v228_v39, %v937_v47  ;;  %v256_v49 = vmul.f32 %v937_v47, %v937_v47  ;;  %v942_v50 = vpop.f32.mrb[5].mxu0 }
 0x135   :  { %v240_v51 = vadd.f32 %v239_v43, %v942_v50  ;;  %v257_v52 = vmul.f32 %v942_v50, %v942_v50  ;;  %v947_v53 = vpop.f32.mrb[6].mxu0 }
 0x136   :  { %v265_v54 = vadd.f32 %v264_v45, %v256_v49  ;;  %v230_v55 = vadd.f32 %v229_v48, %v947_v53  ;;  %v258_v56 = vmul.f32 %v947_v53, %v947_v53  ;;  %v952_v57 = vpop.f32.mrb[7].mxu0 }
 0x137   :  { %v276_v58 = vadd.f32 %v275_v46, %v257_v52  ;;  %v241_v59 = vadd.f32 %v240_v51, %v952_v57  ;;  %v259_v60 = vmul.f32 %v952_v57, %v952_v57 }
 0x138   :  { %v266_v61 = vadd.f32 %v265_v54, %v258_v56 }
 0x139   :  { %v277_v62 = vadd.f32 %v276_v58, %v259_v60  ;;  %v301_v60 = vlaneseq }
 0x13b   :  { %v957_v63 = vpop.f32.mrb[8].mxu0 }
 0x13c   :  { %v231_v0 = vadd.f32 %v230_v55, %v957_v63  ;;  %v260_v1 = vmul.f32 %v957_v63, %v957_v63  ;;  %v962_v2 = vpop.f32.mrb[9].mxu0 }
 0x13d   :  { %v242_v3 = vadd.f32 %v241_v59, %v962_v2  ;;  %v261_v4 = vmul.f32 %v962_v2, %v962_v2  ;;  %v967_v5 = vpop.f32.mrb[10].mxu0 }
 0x13e   :  { %v267_v6 = vadd.f32 %v266_v61, %v260_v1  ;;  %v232_v7 = vadd.f32 %v231_v0, %v967_v5  ;;  %v262_v8 = vmul.f32 %v967_v5, %v967_v5  ;;  %v972_v9 = vpop.f32.mrb[11].mxu0  ;;  %v302_v61 = vshrl.u32 %v301_v60, 7  ;;  %v541_v1 = vld [vmem:[%s1076_s3 + $0x4] sm:$0x1] }
 0x13f   :  { %v278_v10 = vadd.f32 %v277_v62, %v261_v4  ;;  %v243_v11 = vadd.f32 %v242_v3, %v972_v9  ;;  %v263_v12 = vmul.f32 %v972_v9, %v972_v9  ;;  %v294_v62 = vld [vmem:[%s1076_s3] sm:$0x1] }
 0x140   :  { %v233_v13 = vrot.slane %v232_v7, 4  ;;  %v268_v14 = vadd.f32 %v267_v6, %v262_v8  ;;  %v980_v0 = vsub.s32 0, %v302_v61 }
 0x141   :  { %v244_v15 = vrot.slane %v243_v11, 4  ;;  %v279_v16 = vadd.f32 %v278_v10, %v263_v12  ;;  %v542_v12 = vld [vmem:[%s1076_s3 + $0x5] sm:$0x1] }
 0x142   :  { %v234_v17 = vadd.f32 %v233_v13, %v232_v7  ;;  %v269_v18 = vrot.slane %v268_v14, 4  ;;  %v295_v7 = vld [vmem:[%s1076_s3 + $0x1] sm:$0x1] }
 0x143   :  { %v245_v19 = vadd.f32 %v244_v15, %v243_v11  ;;  %v280_v20 = vrot.slane %v279_v16, 4 }
 0x144   :  { %v235_v21 = vrot.slane %v234_v17, 2  ;;  %v270_v22 = vadd.f32 %v269_v18, %v268_v14 }
 0x145   :  { %v246_v23 = vrot.slane %v245_v19, 2  ;;  %v281_v24 = vadd.f32 %v280_v20, %v279_v16 }
 0x146   :  { %v236_v25 = vadd.f32 %v235_v21, %v234_v17  ;;  %v271_v26 = vrot.slane %v270_v22, 2 }
 0x147   :  { %v247_v28 = vadd.f32 %v246_v23, %v245_v19  ;;  %v282_v29 = vrot.slane %v281_v24, 2 }
 0x148   :  { %v237_v30 = vrot.slane %v236_v25, 1  ;;  %v272_v31 = vadd.f32 %v271_v26, %v270_v22 }
 0x149   :  { %v248_v32 = vrot.slane %v247_v28, 1  ;;  %v283_v33 = vadd.f32 %v282_v29, %v281_v24 }
 0x14a   :  { %v238_v34 = vadd.f32 %v237_v30, %v236_v25  ;;  %v273_v38 = vrot.slane %v272_v31, 1 }
 0x14b   :  { %v249_v39 = vadd.f32 %v248_v32, %v247_v28  ;;  %v284_v40 = vrot.slane %v283_v33, 1 }
 0x14c   :  { %v250_v42 = vmul.f32 0.020833334, %v238_v34  ;;  %v274_v43 = vadd.f32 %v273_v38, %v272_v31 }
 0x14d   :  { %v251_v44 = vmul.f32 0.020833334, %v249_v39  ;;  %v285_v45 = vadd.f32 %v284_v40, %v283_v33 }
 0x14e   :  { %v286_v46 = vmul.f32 0.020833334, %v274_v43  ;;  %v288_v48 = vmul.f32 %v250_v42, %v250_v42 }
 0x14f   :  { %v287_v49 = vmul.f32 0.020833334, %v285_v45  ;;  %v289_v51 = vmul.f32 %v251_v44, %v251_v44 }
 0x150   :  { %v290_v52 = vsub.f32 %v286_v46, %v288_v48 }
 0x151   :  { %v291_v54 = vsub.f32 %v287_v49, %v289_v51 }
 0x152   :  { %v292_v55 = vmax.f32 %v290_v52, 0.0 }
 0x153   :  { %v293_v56 = vmax.f32 %v291_v54, 0.0 }
 0x154   :  { %v296_v58 = vadd.f32 1e-05, %v292_v55 }
 0x155   :  { %v543_v59 = vadd.f32 1e-05, %v293_v56 }
 0x156   :  { %722 = vrsqrt.f32 %v296_v58 }
 0x157   :  { %724 = vrsqrt.f32 %v543_v59 }
 0x160   :  { %v723_v3 = vpop.eup %722 }
 0x161   :  { %v725_v4 = vpop.eup %724  ;;  %v298_v6 = vmul.f32 %v723_v3, %v294_v62 }
 0x162   :  { %v545_v8 = vmul.f32 %v725_v4, %v541_v1 }
 0x163   :  { %v299_v10 = vmul.f32 %v298_v6, %v250_v42  ;;  %v304_v11 = vrot.slane %v298_v6, %v980_v0 }
 0x164   :  { %v546_v13 = vmul.f32 %v545_v8, %v251_v44  ;;  %v551_v14 = vrot.slane %v545_v8, %v980_v0 }
 0x165   :  { %v300_v15 = vsub.f32 %v295_v7, %v299_v10  ;;  %v310_v16 = vmul.f32 %v304_v11, %v967_v5  ;;  %v305_v17 = vmul.f32 %v304_v11, %v917_v35  ;;  %v306_v18 = vmul.f32 %v304_v11, %v921_v37 }
 0x166   :  { %v547_v19 = vsub.f32 %v542_v12, %v546_v13  ;;  %v557_v20 = vmul.f32 %v551_v14, %v972_v9  ;;  %v307_v21 = vmul.f32 %v304_v11, %v937_v47  ;;  %v308_v22 = vmul.f32 %v304_v11, %v947_v53 }
 0x167   :  { %v314_v23 = vrot.slane %v300_v15, %v980_v0  ;;  %v309_v24 = vmul.f32 %v304_v11, %v957_v63  ;;  %v552_v25 = vmul.f32 %v551_v14, %v919_v36  ;;  %v553_v26 = vmul.f32 %v551_v14, %v929_v41 }
 0x168   :  { %v561_v5 = vrot.slane %v547_v19, %v980_v0  ;;  %v554_v35 = vmul.f32 %v551_v14, %v942_v50  ;;  %v555_v37 = vmul.f32 %v551_v14, %v952_v57  ;;  %v556_v9 = vmul.f32 %v551_v14, %v962_v2 }
 0x169   :  { %v320_v28 = vadd.f32 %v314_v23, %v310_v16  ;;  %v315_v47 = vadd.f32 %v314_v23, %v305_v17  ;;  %v316_v29 = vadd.f32 %v314_v23, %v306_v18  ;;  %v317_v53 = vadd.f32 %v314_v23, %v307_v21 }
 0x16a   :  { %v1007_v30 = vadd.f32 %v561_v5, %v557_v20  ;;  %v318_v31 = vadd.f32 %v314_v23, %v308_v22  ;;  %v319_v63 = vadd.f32 %v314_v23, %v309_v24  ;;  %v1009_v32 = vadd.f32 %v561_v5, %v552_v25 }
 0x16b   :  { %vm321_vm1 = vcmp.ge.f32.partialorder %v315_v47, 0.0  ;;  %vm322_vm2 = vcmp.ge.f32.partialorder %v316_v29, 0.0  ;;  %v327_v36 = vmul.f32 0.15, %v315_v47  ;;  %v328_v41 = vmul.f32 0.15, %v316_v29 }
 0x16c   :  { %vm323_vm3 = vcmp.ge.f32.partialorder %v317_v53, 0.0  ;;  %vm324_vm4 = vcmp.ge.f32.partialorder %v318_v31, 0.0  ;;  %v329_v33 = vmul.f32 0.15, %v317_v53  ;;  %v330_v2 = vmul.f32 0.15, %v318_v31 }
 0x16d   :  { %v333_v50 = vsel %vm321_vm1, %v315_v47, %v327_v36  ;;  %v334_v57 = vsel %vm322_vm2, %v316_v29, %v328_v41  ;;  %vm325_vm5 = vcmp.ge.f32.partialorder %v319_v63, 0.0  ;;  %vm326_vm6 = vcmp.ge.f32.partialorder %v320_v28, 0.0 }
 0x16e   :  { %v339_v34 = vpack.c.bf16 %v334_v57, %v333_v50  ;;  %v335_v38 = vsel %vm323_vm3, %v317_v53, %v329_v33  ;;  %v336_v39 = vsel %vm324_vm4, %v318_v31, %v330_v2  ;;  %v331_v40 = vmul.f32 0.15, %v319_v63  ;;  %v496_v33 = vld [vmem:[%s1076_s3 + $0x2] sm:$0x1] }
 0x16f   :  { %v332_v42 = vmul.f32 0.15, %v320_v28  ;;  %v340_v43 = vpack.c.bf16 %v336_v39, %v335_v38  ;;  %v1011_v44 = vadd.f32 %v561_v5, %v553_v26  ;;  %v1013_v45 = vadd.f32 %v561_v5, %v554_v35  ;;  %v497_v39 = vld [vmem:[%s1076_s3 + $0x3] sm:$0x1]  ;;  %s832_s3 = smov [#allocation8]  }
 0x170   :  { %668 = vmatmul.mubr.bf16.vlgmr.msra.gmra.mrb[0].mxu1 %v339_v34  ;;  %v1015_v46 = vadd.f32 %v561_v5, %v555_v37  ;;  %v337_v48 = vsel %vm325_vm5, %v319_v63, %v331_v40  ;;  %v1019_v51 = vadd.f32 %v561_v5, %v556_v9  ;;  %vm573_vm7 = vcmp.ge.f32.partialorder %v1007_v30, 0.0  ;;  %s603_s13 = sshll.u32 %s832_s3, 4  ;;  %s604_s13 = int_to_ptr.vmem [resolvable:$true] %s603_s13 }
 0x171   :  { %671 = vmatprep.mubr.msk.bf16.mxu1 %vm831_vm0, %v830_v27  ;;  %v338_v49 = vsel %vm326_vm6, %v320_v28, %v332_v42  ;;  %v579_v38 = vmul.f32 0.15, %v1007_v30  ;;  %vm568_vm8 = vcmp.ge.f32.partialorder %v1009_v32, 0.0  ;;  %vm569_vm9 = vcmp.ge.f32.partialorder %v1011_v44, 0.0  ;;  %s794_s14 = scalar_lea.vmem %s604_s13, 768  ;;  %p799_p11 = scmp.lt.s32.totalorder %s604_s13, %s604_s13 }
 0x172   :  { %v341_v52 = vpack.c.bf16 %v338_v49, %v337_v48  ;;  %v575_v48 = vmul.f32 0.15, %v1011_v44  ;;  %v576_v49 = vmul.f32 0.15, %v1013_v45  ;;  %vm570_vm10 = vcmp.ge.f32.partialorder %v1013_v45, 0.0  ;;  %p795_p10 = scmp.ne.s32.totalorder %s604_s13, %s794_s14  ;;  %p800_p12 = scmp.lt.s32.totalorder %s794_s14, %s794_s14 }
 0x173   :  { %vm571_vm11 = vcmp.ge.f32.partialorder %v1015_v46, 0.0  ;;  %vm572_vm12 = vcmp.ge.f32.partialorder %v1019_v51, 0.0 }
 0x174   :  { %p801_p13 = por %p800_p12, %p799_p11 }
 0x176   :  { %p802_p0 = pnand %p801_p13, %p795_p10 }
 0x178   :  { %672 = vmatmul.mubr.bf16.gmra.mrb[4].mxu1 %v340_v43  ;;  %v574_v43 = vmul.f32 0.15, %v1009_v32 }
 0x179   :  { %675 = vmatprep.mubr.msk.bf16.mxu1 %vm831_vm0, %v830_v27 }
 0x180   :  { %676 = vmatmul.mubr.bf16.gmra.mrb[8].mxu1 %v341_v52 }
 0x243   :  { %v440_v54 = vpop.f32.mrb[0].mxu1 }
 0x244   :  { %v669_v55 = vpop.f32.mrb[1].mxu1  ;;  %v475_v58 = vmul.f32 %v440_v54, %v440_v54 }
 0x245   :  { %v443_v56 = vpop.f32.mrb[2].mxu1 }
 0x246   :  { %v463_v59 = vadd.f32 %v443_v56, %v440_v54  ;;  %v476_v60 = vmul.f32 %v443_v56, %v443_v56  ;;  %v670_v61 = vpop.f32.mrb[3].mxu1 }
 0x248   :  { %v481_v62 = vadd.f32 %v476_v60, %v475_v58 }
 0x24b   :  { %v448_v1 = vpop.f32.mrb[4].mxu1 }
 0x24c   :  { %v464_v3 = vadd.f32 %v463_v59, %v448_v1  ;;  %v477_v4 = vmul.f32 %v448_v1, %v448_v1  ;;  %v673_v6 = vpop.f32.mrb[5].mxu1 }
 0x24d   :  { %v451_v7 = vpop.f32.mrb[6].mxu1 }
 0x24e   :  { %v482_v8 = vadd.f32 %v481_v62, %v477_v4  ;;  %v465_v10 = vadd.f32 %v464_v3, %v451_v7  ;;  %v478_v11 = vmul.f32 %v451_v7, %v451_v7  ;;  %v674_v12 = vpop.f32.mrb[7].mxu1  ;;  %v577_v3 = vmul.f32 0.15, %v1015_v46 }
 0x24f   :  { %v585_v4 = vsel %vm573_vm7, %v1007_v30, %v579_v38  ;;  %v582_v12 = vsel %vm570_vm10, %v1013_v45, %v576_v49 }
 0x250   :  { %v483_v13 = vadd.f32 %v482_v8, %v478_v11 }
 0x253   :  { %v456_v27 = vpop.f32.mrb[8].mxu1 }
 0x254   :  { %v466_v14 = vadd.f32 %v465_v10, %v456_v27  ;;  %v479_v15 = vmul.f32 %v456_v27, %v456_v27  ;;  %v677_v16 = vpop.f32.mrb[9].mxu1 }
 0x255   :  { %v459_v17 = vpop.f32.mrb[10].mxu1 }
 0x256   :  { %v484_v18 = vadd.f32 %v483_v13, %v479_v15  ;;  %v467_v19 = vadd.f32 %v466_v14, %v459_v17  ;;  %v480_v20 = vmul.f32 %v459_v17, %v459_v17  ;;  %v678_v21 = vpop.f32.mrb[11].mxu1  ;;  %v583_v13 = vsel %vm571_vm11, %v1015_v46, %v577_v3 }
 0x258   :  { %v468_v22 = vrot.slane %v467_v19, 4  ;;  %v485_v23 = vadd.f32 %v484_v18, %v480_v20 }
 0x25a   :  { %v469_v24 = vadd.f32 %v468_v22, %v467_v19  ;;  %v486_v25 = vrot.slane %v485_v23, 4 }
 0x25c   :  { %v470_v26 = vrot.slane %v469_v24, 2  ;;  %v487_v5 = vadd.f32 %v486_v25, %v485_v23 }
 0x25e   :  { %v471_v35 = vadd.f32 %v470_v26, %v469_v24  ;;  %v488_v37 = vrot.slane %v487_v5, 2 }
 0x260   :  { %v472_v9 = vrot.slane %v471_v35, 1  ;;  %v489_v28 = vadd.f32 %v488_v37, %v487_v5 }
 0x262   :  { %v473_v47 = vadd.f32 %v472_v9, %v471_v35  ;;  %v490_v29 = vrot.slane %v489_v28, 1 }
 0x264   :  { %v474_v53 = vmul.f32 0.020833334, %v473_v47  ;;  %v491_v31 = vadd.f32 %v490_v29, %v489_v28 }
 0x266   :  { %v492_v63 = vmul.f32 0.020833334, %v491_v31  ;;  %v493_v36 = vmul.f32 %v474_v53, %v474_v53 }
 0x268   :  { %v494_v41 = vsub.f32 %v492_v63, %v493_v36 }
 0x26a   :  { %v495_v50 = vmax.f32 %v494_v41, 0.0 }
 0x26c   :  { %v498_v57 = vadd.f32 1e-05, %v495_v50 }
 0x26e   :  { %726 = vrsqrt.f32 %v498_v57 }
 0x278   :  { %v727_v2 = vpop.eup %726 }
 0x279   :  { %v500_v34 = vmul.f32 %v727_v2, %v496_v33 }
 0x27b   :  { %v501_v40 = vmul.f32 %v500_v34, %v474_v53  ;;  %v506_v42 = vrot.slane %v500_v34, %v980_v0 }
 0x27d   :  { %v502_v52 = vsub.f32 %v497_v39, %v501_v40  ;;  %v512_v55 = vmul.f32 %v506_v42, %v459_v17  ;;  %v507_v58 = vmul.f32 %v506_v42, %v440_v54  ;;  %v508_v59 = vmul.f32 %v506_v42, %v443_v56 }
 0x27e   :  { %v509_v60 = vmul.f32 %v506_v42, %v448_v1  ;;  %v510_v61 = vmul.f32 %v506_v42, %v451_v7  ;;  %v511_v62 = vmul.f32 %v506_v42, %v456_v27  ;;  %v578_v54 = vmul.f32 0.15, %v1019_v51 }
 0x27f   :  { %v516_v6 = vrot.slane %v502_v52, %v980_v0  ;;  %v580_v56 = vsel %vm568_vm8, %v1009_v32, %v574_v43  ;;  %v581_v1 = vsel %vm569_vm9, %v1011_v44, %v575_v48 }
 0x280   :  { %v584_v45 = vsel %vm572_vm12, %v1019_v51, %v578_v54 }
 0x281   :  { %v522_v7 = vadd.f32 %v516_v6, %v512_v55  ;;  %v517_v30 = vadd.f32 %v516_v6, %v507_v58  ;;  %v518_v8 = vadd.f32 %v516_v6, %v508_v59  ;;  %v519_v0 = vadd.f32 %v516_v6, %v509_v60 }
 0x282   :  { %v520_v10 = vadd.f32 %v516_v6, %v510_v61  ;;  %v521_v11 = vadd.f32 %v516_v6, %v511_v62 }
 0x283   :  { %vm528_vm13 = vcmp.ge.f32.partialorder %v522_v7, 0.0  ;;  %v534_v27 = vmul.f32 0.15, %v522_v7  ;;  %vm523_vm14 = vcmp.ge.f32.partialorder %v517_v30, 0.0  ;;  %vm524_vm15 = vcmp.ge.f32.partialorder %v518_v8, 0.0 }
 0x284   :  { %vm525_vm0 = vcmp.ge.f32.partialorder %v519_v0, 0.0  ;;  %vm526_vm1 = vcmp.ge.f32.partialorder %v520_v10, 0.0  ;;  %vm527_vm2 = vcmp.ge.f32.partialorder %v521_v11, 0.0  ;;  %v529_v32 = vmul.f32 0.15, %v517_v30 }
 0x285   :  { %v540_v14 = vsel %vm528_vm13, %v522_v7, %v534_v27  ;;  %v530_v44 = vmul.f32 0.15, %v518_v8  ;;  %v531_v15 = vmul.f32 0.15, %v519_v0  ;;  %v532_v16 = vmul.f32 0.15, %v520_v10 }
 0x286   :  { %v591_v17 = vadd.f32 %v585_v4, %v540_v14  ;;  %v533_v18 = vmul.f32 0.15, %v521_v11  ;;  %v535_v19 = vsel %vm523_vm14, %v517_v30, %v529_v32 }
 0x287   :  { %v536_v46 = vsel %vm524_vm15, %v518_v8, %v530_v44  ;;  %v537_v20 = vsel %vm525_vm0, %v519_v0, %v531_v15  ;;  %v538_v21 = vsel %vm526_vm1, %v520_v10, %v532_v16  ;;  %v586_v22 = vadd.f32 %v580_v56, %v535_v19 }
 0x288   :  { %597 = vst [vmem:[#allocation8 + $0x28] sm:$0xff] %v591_v17  ;;  %v539_v23 = vsel %vm527_vm2, %v521_v11, %v533_v18  ;;  %v587_v24 = vadd.f32 %v581_v1, %v536_v46  ;;  %v588_v25 = vadd.f32 %v582_v12, %v537_v20  ;;  %v589_v26 = vadd.f32 %v583_v13, %v538_v21 }
 0x289   :  { %v590_v5 = vadd.f32 %v584_v45, %v539_v23  ;;  %592 = vst [vmem:[#allocation8] sm:$0xff] %v586_v22 }
 0x28a   :  { %593 = vst [vmem:[#allocation8 + $0x8] sm:$0xff] %v587_v24  ;;  %594 = vst [vmem:[#allocation8 + $0x10] sm:$0xff] %v588_v25 }
 0x28b   :  { %595 = vst [vmem:[#allocation8 + $0x18] sm:$0xff] %v589_v26  ;;  %596 = vst [vmem:[#allocation8 + $0x20] sm:$0xff] %v590_v5 }
 0x28c   :  { %805 = shalt.err (!%p802_p0)
}
 0x28d   :  { %s806_s17 = scalar_lea.hbm %s1077_s4, 768 }
 0x28e   :  { %p807_p1 = scmp.ne.s32.totalorder %s1077_s4, %s806_s17  ;;  %p810_p2 = scmp.lt.u32.totalorder %s806_s17, %s1077_s4 }
 0x290   :  { %p812_p3 = pnand %p810_p2, %p807_p1 }
 0x292   :  { %815 = shalt.err (!%p812_p3)
}
 0x293   :  { %609 = dma.vmem_to_hbm [thread:$0]  %s604_s13, 768, %s1077_s4, [#allocation4], %s824_s27, %s824_s27, %s825_s28  }
 0x294   :  { %820 = dma.done.wait [#allocation4], 768  }
 0x295   :  { %821 = vsyncadd [#allocation4], 4294966528 }
 0x296   :  { %613 = vsyncpa [#allocation3], 1 }
 0x297   :  { %614 = vsyncpa [#allocation6], 1 }
 0x298   :  { %615 = vsyncpa [#allocation4], 1 }

</bundles_post_ra>
